<compile_context>
chip_gen: v6e
topology: v6e:2x2x1
jax: 0.10.0
libtpu: 0.0.40
codegen_flags: <defaults>
</compile_context>

<pallas_src>
import numpy as np
import jax
import jax.numpy as jnp
from jax.experimental import pallas as pl
from jax.experimental.pallas import tpu as pltpu

# ----------------------------------------------------------------------------
# Problem sizes (consistent with the module: 32*(H-4)*(W-4) must equal 192)
# ----------------------------------------------------------------------------
B = 2                               # batch
C_IN, H_IN, W_IN = 4, 7, 6          # real_shape_view
ISV = C_IN * H_IN * W_IN            # input_shape_view = 168
F_DIM = 8                           # input_shape_feature
HID = 32                            # args.mlp_hidden_dim[0]
N_ACT = 5                           # args.n_actions
K = 3                               # conv kernel size
OH1, OW1 = H_IN - 2, W_IN - 2       # after conv1 -> 5, 4
OH2, OW2 = OH1 - 2, OW1 - 2         # after conv2 -> 3, 2   (32*3*2 == 192)
FLAT = 32 * OH2 * OW2               # 192
XCOLS = W_IN * C_IN                 # 24 lanes of the packed runtime input


# ----------------------------------------------------------------------------
# Fused kernel (closure over the static weight-buffer layout)
# ----------------------------------------------------------------------------
def make_kernel(batch, layout):
    b = batch

    def kernel(xbuf_ref, wbuf_ref, q_ref, h1_ref, h2_ref):
        f32 = jnp.float32

        def w(name):                      # static slice of the packed weight buffer
            r0, nr, nc = layout[name]
            return wbuf_ref[r0:r0 + nr, 0:nc]

        # ---- conv1 + ReLU: 3 banded-weight matmuls (one per kernel row kh) ----
        # Row selection per kh is a static sublane slice; the kw taps live in the
        # band structure of w1_kh built offline.
        p1 = [jnp.dot(xbuf_ref[kh * b:(kh + OH1) * b, 0:XCOLS], w(f"w1_{kh}"),
                      preferred_element_type=f32) for kh in range(K)]
        h1_ref[...] = jnp.maximum(p1[0] + p1[1] + p1[2] + w("b1"), 0.0)   # (OH1*b, OW1*32)

        # ---- conv2 + ReLU ----
        p2 = [jnp.dot(h1_ref[kh * b:(kh + OH2) * b, :], w(f"w2_{kh}"),
                      preferred_element_type=f32) for kh in range(K)]
        h2_ref[...] = jnp.maximum(p2[0] + p2[1] + p2[2] + w("b2"), 0.0)   # (OH2*b, OW2*32)

        # ---- fc1 + ReLU: torch CHW flatten folded into per-row (y2) weight blocks ----
        p3 = [jnp.dot(h2_ref[i * b:(i + 1) * b, :], w(f"wfc1_{i}"),
                      preferred_element_type=f32) for i in range(OH2)]
        x1 = jnp.maximum(p3[0] + p3[1] + p3[2] + w("fc1_b"), 0.0)         # (b, HID)

        # ---- fc2 + ReLU: cat(x1, feature) as split-weight matmuls ----
        feat = xbuf_ref[H_IN * b:(H_IN + 1) * b, 0:F_DIM]                 # (b, F_DIM)
        h = jnp.maximum(jnp.dot(x1, w("fc2_wa"), preferred_element_type=f32)
                        + jnp.dot(feat, w("fc2_wb"), preferred_element_type=f32)
                        + w("fc2_b"), 0.0)                                # (b, HID)

        # ---- fc3 ----
        q_ref[...] = jnp.dot(h, w("fc3_w"), preferred_element_type=f32) + w("fc3_b")

    return kernel


# ----------------------------------------------------------------------------
# One-time offline weight repacking into a single (rows, 128) f32 buffer
# ----------------------------------------------------------------------------
def _pack_blocks(blocks):
    """blocks: list of (name, 2-D np.float32).  Returns (packed (R,128) array,
    layout dict name -> (row_off, rows, cols)) with 8-aligned row offsets."""
    layout, row = {}, 0
    for name, a in blocks:
        layout[name] = (row, a.shape[0], a.shape[1])
        row += int(np.ceil(a.shape[0] / 8) * 8)
    buf = np.zeros((row, 128), np.float32)
    for name, a in blocks:
        r0, nr, nc = layout[name]
        buf[r0:r0 + nr, :nc] = a
    return jnp.asarray(buf), layout


def prepare_params(params):
    """Offline: fold conv taps into banded weights, fold the torch CHW flatten into
    fc1 blocks, transpose fc weights, and pack everything into one buffer."""
    p = {k: np.asarray(v) for k, v in params.items()}
    blocks = []

    # conv1: per-kh banded weight  W1_kh[x*C + c, j*32 + oc] = w1[oc, c, kh, x - j]
    for kh in range(K):
        wk = np.zeros((W_IN * C_IN, OW1 * 32), np.float32)
        for j in range(OW1):
            for kw in range(K):
                x = j + kw
                wk[x * C_IN:(x + 1) * C_IN, j * 32:(j + 1) * 32] = p["w1"][:, :, kh, kw].T
        blocks.append((f"w1_{kh}", wk))
    blocks.append(("b1", np.tile(p["b1"], OW1).reshape(1, OW1 * 32)))

    # conv2: per-kh banded weight  W2_kh[x*32 + ci, j*32 + co] = w2[co, ci, kh, x - j]
    for kh in range(K):
        wk = np.zeros((OW1 * 32, OW2 * 32), np.float32)
        for j in range(OW2):
            for kw in range(K):
                x = j + kw
                wk[x * 32:(x + 1) * 32, j * 32:(j + 1) * 32] = p["w2"][:, :, kh, kw].T
        blocks.append((f"w2_{kh}", wk))
    blocks.append(("b2", np.tile(p["b2"], OW2).reshape(1, OW2 * 32)))

    # fc1: torch flat index = c*(OH2*OW2) + y2*OW2 + x2 -> per-y2 block (OW2*32, HID)
    fc1_r = p["fc1_w"].reshape(HID, 32, OH2, OW2)                    # [h, c, y2, x2]
    for i in range(OH2):
        wk = np.transpose(fc1_r[:, :, i, :], (2, 1, 0)).reshape(OW2 * 32, HID)
        blocks.append((f"wfc1_{i}", wk))
    blocks.append(("fc1_b", p["fc1_b"].reshape(1, HID)))

    blocks.append(("fc2_wa", p["fc2_w"][:, :HID].T))                 # (HID, HID)
    blocks.append(("fc2_wb", p["fc2_w"][:, HID:].T))                 # (F_DIM, HID)
    blocks.append(("fc2_b", p["fc2_b"].reshape(1, HID)))
    blocks.append(("fc3_w", p["fc3_w"].T))                           # (HID, N_ACT)
    blocks.append(("fc3_b", p["fc3_b"].reshape(1, N_ACT)))
    return _pack_blocks(blocks)


# ----------------------------------------------------------------------------
# Runtime input packing (layout plumbing only, outside the kernel)
# ----------------------------------------------------------------------------
def pack_obs(obs):
    """One (H*B + B, W*C) buffer: rows [0, H*B) = image with row = y*B + b and
    col = x*C + c (y-major/b-minor, x-major/c-minor); rows [H*B, H*B+B) = feature."""
    b = obs.shape[0]
    view = obs[:, :ISV].reshape(b, C_IN, H_IN, W_IN)                 # torch .view (NCHW)
    x2d = jnp.transpose(view, (2, 0, 3, 1)).reshape(H_IN * b, W_IN * C_IN)
    feat = obs[:, -F_DIM:]
    xbuf = jnp.zeros((H_IN * b + b, W_IN * C_IN), jnp.float32)
    xbuf = xbuf.at[:H_IN * b, :].set(x2d)
    xbuf = xbuf.at[H_IN * b:, :F_DIM].set(feat)
    return xbuf


def _flops_per_step(batch):
    return 2 * (batch * OH1 * OW1 * 32 * (K * K * C_IN)        # conv1
                + batch * OH2 * OW2 * 32 * (K * K * 32)        # conv2
                + batch * HID * FLAT                            # fc1
                + batch * HID * (HID + F_DIM)                   # fc2
                + batch * N_ACT * HID)                          # fc3


# ----------------------------------------------------------------------------
# Single-call forward (one pallas_call, 2 input DMAs, everything fused)
# ----------------------------------------------------------------------------
def build_forward(layout, batch):
    kernel = make_kernel(batch, layout)

    @jax.jit
    def fwd(obs, wbuf):
        xbuf = pack_obs(obs)
        bytes_acc = (xbuf.size + wbuf.size + batch * N_ACT) * 4
        return pl.pallas_call(
            kernel,
            out_shape=jax.ShapeDtypeStruct((batch, N_ACT), jnp.float32),
            in_specs=[pl.BlockSpec(memory_space=pltpu.MemorySpace.VMEM),
                      pl.BlockSpec(memory_space=pltpu.MemorySpace.VMEM)],
            out_specs=pl.BlockSpec(memory_space=pltpu.MemorySpace.VMEM),
            scratch_shapes=[pltpu.VMEM((OH1 * batch, OW1 * 32), jnp.float32),
                            pltpu.VMEM((OH2 * batch, OW2 * 32), jnp.float32)],
            cost_estimate=pl.CostEstimate(flops=_flops_per_step(batch),
                                          transcendentals=0,
                                          bytes_accessed=bytes_acc),
        )(xbuf, wbuf)

    return fwd


# ----------------------------------------------------------------------------
# Amortized multi-step forward: grid over timesteps, weights VMEM-resident
# ----------------------------------------------------------------------------
def build_forward_steps(layout, batch):
    kernel = make_kernel(batch, layout)
    xrows = (H_IN + 1) * batch

    @jax.jit
    def fwd(obs_steps, wbuf):                       # obs_steps: (T, batch, ISV+F_DIM)
        steps = obs_steps.shape[0]
        xbufs = jax.vmap(pack_obs)(obs_steps)       # (T, xrows, XCOLS)
        return pl.pallas_call(
            kernel,
            grid=(steps,),
            out_shape=jax.ShapeDtypeStruct((steps, batch, N_ACT), jnp.float32),
            in_specs=[pl.BlockSpec((None, xrows, XCOLS), lambda t: (t, 0, 0)),
                      # constant block index -> weight buffer DMA'd once, stays resident
                      pl.BlockSpec(wbuf.shape, lambda t: (0, 0))],
            out_specs=pl.BlockSpec((None, batch, N_ACT), lambda t: (t, 0, 0)),
            scratch_shapes=[pltpu.VMEM((OH1 * batch, OW1 * 32), jnp.float32),
                            pltpu.VMEM((OH2 * batch, OW2 * 32), jnp.float32)],
            compiler_params=pltpu.CompilerParams(
                dimension_semantics=("parallel",)),   # steps are independent
            cost_estimate=pl.CostEstimate(
                flops=_flops_per_step(batch) * steps, transcendentals=0,
                bytes_accessed=(wbuf.size + steps * (xrows * XCOLS + batch * N_ACT)) * 4),
        )(xbufs, wbuf)

    return fwd


# ----------------------------------------------------------------------------
# Pure-JAX reference (mirrors the PyTorch forward)
# ----------------------------------------------------------------------------
def reference_forward(obs, params):
    b = obs.shape[0]
    view = obs[:, :ISV].reshape(b, C_IN, H_IN, W_IN)
    feat = obs[:, -F_DIM:]
    dn = ("NCHW", "OIHW", "NCHW")
    hi = jax.lax.Precision.HIGHEST
    out = jax.lax.conv_general_dilated(view, params["w1"], (1, 1), "VALID",
                                       dimension_numbers=dn, precision=hi)
    out = jnp.maximum(out + params["b1"][None, :, None, None], 0.0)
    out = jax.lax.conv_general_dilated(out, params["w2"], (1, 1), "VALID",
                                       dimension_numbers=dn, precision=hi)
    out = jnp.maximum(out + params["b2"][None, :, None, None], 0.0)
    out = out.reshape(b, FLAT)
    x = jnp.maximum(jnp.dot(out, params["fc1_w"].T, precision=hi) + params["fc1_b"], 0.0)
    h = jnp.concatenate([x, feat], axis=1)
    h = jnp.maximum(jnp.dot(h, params["fc2_w"].T, precision=hi) + params["fc2_b"], 0.0)
    return jnp.dot(h, params["fc3_w"].T, precision=hi) + params["fc3_b"]


# ----------------------------------------------------------------------------
# Deterministic parameters / inputs and run
# ----------------------------------------------------------------------------
def make_params(key):
    ks = jax.random.split(key, 10)
    s = 0.1
    return {
        "w1": s * jax.random.normal(ks[0], (32, C_IN, 3, 3), jnp.float32),
        "b1": s * jax.random.normal(ks[1], (32,), jnp.float32),
        "w2": s * jax.random.normal(ks[2], (32, 32, 3, 3), jnp.float32),
        "b2": s * jax.random.normal(ks[3], (32,), jnp.float32),
        "fc1_w": s * jax.random.normal(ks[4], (HID, FLAT), jnp.float32),
        "fc1_b": s * jax.random.normal(ks[5], (HID,), jnp.float32),
        "fc2_w": s * jax.random.normal(ks[6], (HID, HID + F_DIM), jnp.float32),
        "fc2_b": s * jax.random.normal(ks[7], (HID,), jnp.float32),
        "fc3_w": s * jax.random.normal(ks[8], (N_ACT, HID), jnp.float32),
        "fc3_b": s * jax.random.normal(ks[9], (N_ACT,), jnp.float32),
    }


if __name__ == "__main__":
    key = jax.random.PRNGKey(0)
    k_obs, k_par, k_steps = jax.random.split(key, 3)
    obs = jax.random.normal(k_obs, (B, ISV + F_DIM), jnp.float32)
    params = make_params(k_par)

    # One-time offline prep: banded conv weights, folded fc1, one packed buffer.
    wbuf, layout = prepare_params(params)

    # Single-call forward
    fwd = build_forward(layout, B)
    q = jax.block_until_ready(fwd(obs, wbuf))
    q_ref = jax.block_until_ready(reference_forward(obs, params))
    assert q.shape == (B, N_ACT) and q.dtype == jnp.float32
    assert jnp.allclose(q, q_ref, rtol=1e-2, atol=1e-2), (q, q_ref)

    # Amortized multi-step forward (weights DMA'd once, VMEM-resident across steps)
    T = 4
    obs_steps = jax.random.normal(k_steps, (T, B, ISV + F_DIM), jnp.float32)
    fwd_steps = build_forward_steps(layout, B)
    q_steps = jax.block_until_ready(fwd_steps(obs_steps, wbuf))
    q_steps_ref = jax.vmap(lambda o: reference_forward(o, params))(obs_steps)
    assert q_steps.shape == (T, B, N_ACT)
    assert jnp.allclose(q_steps, q_steps_ref, rtol=1e-2, atol=1e-2), (q_steps, q_steps_ref)

    print("KERNEL_OK")
</pallas_src>

<mosaic_0001>
module attributes {stable_mosaic.version = 11 : i64} {
  func.func @kernel(%arg0: memref<16x24xf32, #tpu.memory_space<vmem>>, %arg1: memref<760x128xf32, #tpu.memory_space<vmem>>, %arg2: memref<2x5xf32, #tpu.memory_space<vmem>>, %arg3: memref<10x128xf32, #tpu.memory_space<vmem>>, %arg4: memref<6x64xf32, #tpu.memory_space<vmem>>) attributes {dimension_semantics = [], scalar_prefetch = 0 : i64, scratch_operands = 2 : i64, tpu.core_type = #tpu.core_type<tc>} {
    %c0 = arith.constant 0 : index
    %c0_0 = arith.constant 0 : index
    %0 = vector.load %arg0[%c0, %c0_0] : memref<16x24xf32, #tpu.memory_space<vmem>>, vector<10x24xf32>
    %c0_1 = arith.constant 0 : index
    %c0_2 = arith.constant 0 : index
    %1 = vector.load %arg1[%c0_1, %c0_2] : memref<760x128xf32, #tpu.memory_space<vmem>>, vector<24x128xf32>
    %cst = arith.constant dense<0.000000e+00> : vector<10x128xf32>
    %2 = tpu.matmul %0, %1, %cst {dimension_numbers = #tpu.dot_dimension_numbers<[1], [0], [0], [1], [0, 0, 1, 1], [], []>} : vector<10x24xf32>, vector<24x128xf32>, vector<10x128xf32> -> vector<10x128xf32>
    %c2 = arith.constant 2 : index
    %c0_3 = arith.constant 0 : index
    %3 = vector.load %arg0[%c2, %c0_3] : memref<16x24xf32, #tpu.memory_space<vmem>>, vector<10x24xf32>
    %c24 = arith.constant 24 : index
    %c0_4 = arith.constant 0 : index
    %4 = vector.load %arg1[%c24, %c0_4] : memref<760x128xf32, #tpu.memory_space<vmem>>, vector<24x128xf32>
    %cst_5 = arith.constant dense<0.000000e+00> : vector<10x128xf32>
    %5 = tpu.matmul %3, %4, %cst_5 {dimension_numbers = #tpu.dot_dimension_numbers<[1], [0], [0], [1], [0, 0, 1, 1], [], []>} : vector<10x24xf32>, vector<24x128xf32>, vector<10x128xf32> -> vector<10x128xf32>
    %c4 = arith.constant 4 : index
    %c0_6 = arith.constant 0 : index
    %6 = vector.load %arg0[%c4, %c0_6] : memref<16x24xf32, #tpu.memory_space<vmem>>, vector<10x24xf32>
    %c48 = arith.constant 48 : index
    %c0_7 = arith.constant 0 : index
    %7 = vector.load %arg1[%c48, %c0_7] : memref<760x128xf32, #tpu.memory_space<vmem>>, vector<24x128xf32>
    %cst_8 = arith.constant dense<0.000000e+00> : vector<10x128xf32>
    %8 = tpu.matmul %6, %7, %cst_8 {dimension_numbers = #tpu.dot_dimension_numbers<[1], [0], [0], [1], [0, 0, 1, 1], [], []>} : vector<10x24xf32>, vector<24x128xf32>, vector<10x128xf32> -> vector<10x128xf32>
    %9 = arith.addf %2, %5 : vector<10x128xf32>
    %10 = arith.addf %9, %8 : vector<10x128xf32>
    %c72 = arith.constant 72 : index
    %c0_9 = arith.constant 0 : index
    %11 = vector.load %arg1[%c72, %c0_9] : memref<760x128xf32, #tpu.memory_space<vmem>>, vector<1x128xf32>
    %12 = vector.broadcast %11 : vector<1x128xf32> to vector<10x128xf32>
    %13 = arith.addf %10, %12 : vector<10x128xf32>
    %cst_10 = arith.constant 0.000000e+00 : f32
    %14 = vector.broadcast %cst_10 : f32 to vector<10x128xf32>
    %15 = arith.maximumf %13, %14 : vector<10x128xf32>
    %c0_11 = arith.constant 0 : index
    %c0_12 = arith.constant 0 : index
    %16 = vector.load %arg3[%c0_11, %c0_12] : memref<10x128xf32, #tpu.memory_space<vmem>>, vector<10x128xf32>
    tpu.vector_store %arg3[%c0_11, %c0_12], %15 {strides = array<i32>} : memref<10x128xf32, #tpu.memory_space<vmem>>, vector<10x128xf32>,
    %c0_13 = arith.constant 0 : index
    %c0_14 = arith.constant 0 : index
    %17 = vector.load %arg3[%c0_13, %c0_14] : memref<10x128xf32, #tpu.memory_space<vmem>>, vector<6x128xf32>
    %c80 = arith.constant 80 : index
    %c0_15 = arith.constant 0 : index
    %18 = vector.load %arg1[%c80, %c0_15] : memref<760x128xf32, #tpu.memory_space<vmem>>, vector<128x64xf32>
    %cst_16 = arith.constant dense<0.000000e+00> : vector<6x64xf32>
    %19 = tpu.matmul %17, %18, %cst_16 {dimension_numbers = #tpu.dot_dimension_numbers<[1], [0], [0], [1], [0, 0, 1, 1], [], []>} : vector<6x128xf32>, vector<128x64xf32>, vector<6x64xf32> -> vector<6x64xf32>
    %c2_17 = arith.constant 2 : index
    %c0_18 = arith.constant 0 : index
    %20 = vector.load %arg3[%c2_17, %c0_18] : memref<10x128xf32, #tpu.memory_space<vmem>>, vector<6x128xf32>
    %c208 = arith.constant 208 : index
    %c0_19 = arith.constant 0 : index
    %21 = vector.load %arg1[%c208, %c0_19] : memref<760x128xf32, #tpu.memory_space<vmem>>, vector<128x64xf32>
    %cst_20 = arith.constant dense<0.000000e+00> : vector<6x64xf32>
    %22 = tpu.matmul %20, %21, %cst_20 {dimension_numbers = #tpu.dot_dimension_numbers<[1], [0], [0], [1], [0, 0, 1, 1], [], []>} : vector<6x128xf32>, vector<128x64xf32>, vector<6x64xf32> -> vector<6x64xf32>
    %c4_21 = arith.constant 4 : index
    %c0_22 = arith.constant 0 : index
    %23 = vector.load %arg3[%c4_21, %c0_22] : memref<10x128xf32, #tpu.memory_space<vmem>>, vector<6x128xf32>
    %c336 = arith.constant 336 : index
    %c0_23 = arith.constant 0 : index
    %24 = vector.load %arg1[%c336, %c0_23] : memref<760x128xf32, #tpu.memory_space<vmem>>, vector<128x64xf32>
    %cst_24 = arith.constant dense<0.000000e+00> : vector<6x64xf32>
    %25 = tpu.matmul %23, %24, %cst_24 {dimension_numbers = #tpu.dot_dimension_numbers<[1], [0], [0], [1], [0, 0, 1, 1], [], []>} : vector<6x128xf32>, vector<128x64xf32>, vector<6x64xf32> -> vector<6x64xf32>
    %26 = arith.addf %19, %22 : vector<6x64xf32>
    %27 = arith.addf %26, %25 : vector<6x64xf32>
    %c464 = arith.constant 464 : index
    %c0_25 = arith.constant 0 : index
    %28 = vector.load %arg1[%c464, %c0_25] : memref<760x128xf32, #tpu.memory_space<vmem>>, vector<1x64xf32>
    %29 = vector.broadcast %28 : vector<1x64xf32> to vector<6x64xf32>
    %30 = arith.addf %27, %29 : vector<6x64xf32>
    %cst_26 = arith.constant 0.000000e+00 : f32
    %31 = vector.broadcast %cst_26 : f32 to vector<6x64xf32>
    %32 = arith.maximumf %30, %31 : vector<6x64xf32>
    %c0_27 = arith.constant 0 : index
    %c0_28 = arith.constant 0 : index
    %33 = vector.load %arg4[%c0_27, %c0_28] : memref<6x64xf32, #tpu.memory_space<vmem>>, vector<6x64xf32>
    tpu.vector_store %arg4[%c0_27, %c0_28], %32 {strides = array<i32>} : memref<6x64xf32, #tpu.memory_space<vmem>>, vector<6x64xf32>,
    %c0_29 = arith.constant 0 : index
    %c0_30 = arith.constant 0 : index
    %34 = vector.load %arg4[%c0_29, %c0_30] : memref<6x64xf32, #tpu.memory_space<vmem>>, vector<2x64xf32>
    %c472 = arith.constant 472 : index
    %c0_31 = arith.constant 0 : index
    %35 = vector.load %arg1[%c472, %c0_31] : memref<760x128xf32, #tpu.memory_space<vmem>>, vector<64x32xf32>
    %cst_32 = arith.constant dense<0.000000e+00> : vector<2x32xf32>
    %36 = tpu.matmul %34, %35, %cst_32 {dimension_numbers = #tpu.dot_dimension_numbers<[1], [0], [0], [1], [0, 0, 1, 1], [], []>} : vector<2x64xf32>, vector<64x32xf32>, vector<2x32xf32> -> vector<2x32xf32>
    %c2_33 = arith.constant 2 : index
    %c0_34 = arith.constant 0 : index
    %37 = vector.load %arg4[%c2_33, %c0_34] : memref<6x64xf32, #tpu.memory_space<vmem>>, vector<2x64xf32>
    %c536 = arith.constant 536 : index
    %c0_35 = arith.constant 0 : index
    %38 = vector.load %arg1[%c536, %c0_35] : memref<760x128xf32, #tpu.memory_space<vmem>>, vector<64x32xf32>
    %cst_36 = arith.constant dense<0.000000e+00> : vector<2x32xf32>
    %39 = tpu.matmul %37, %38, %cst_36 {dimension_numbers = #tpu.dot_dimension_numbers<[1], [0], [0], [1], [0, 0, 1, 1], [], []>} : vector<2x64xf32>, vector<64x32xf32>, vector<2x32xf32> -> vector<2x32xf32>
    %c4_37 = arith.constant 4 : index
    %c0_38 = arith.constant 0 : index
    %40 = vector.load %arg4[%c4_37, %c0_38] : memref<6x64xf32, #tpu.memory_space<vmem>>, vector<2x64xf32>
    %c600 = arith.constant 600 : index
    %c0_39 = arith.constant 0 : index
    %41 = vector.load %arg1[%c600, %c0_39] : memref<760x128xf32, #tpu.memory_space<vmem>>, vector<64x32xf32>
    %cst_40 = arith.constant dense<0.000000e+00> : vector<2x32xf32>
    %42 = tpu.matmul %40, %41, %cst_40 {dimension_numbers = #tpu.dot_dimension_numbers<[1], [0], [0], [1], [0, 0, 1, 1], [], []>} : vector<2x64xf32>, vector<64x32xf32>, vector<2x32xf32> -> vector<2x32xf32>
    %43 = arith.addf %36, %39 : vector<2x32xf32>
    %44 = arith.addf %43, %42 : vector<2x32xf32>
    %c664 = arith.constant 664 : index
    %c0_41 = arith.constant 0 : index
    %45 = vector.load %arg1[%c664, %c0_41] : memref<760x128xf32, #tpu.memory_space<vmem>>, vector<1x32xf32>
    %46 = vector.broadcast %45 : vector<1x32xf32> to vector<2x32xf32>
    %47 = arith.addf %44, %46 : vector<2x32xf32>
    %cst_42 = arith.constant 0.000000e+00 : f32
    %48 = vector.broadcast %cst_42 : f32 to vector<2x32xf32>
    %49 = arith.maximumf %47, %48 : vector<2x32xf32>
    %c14 = arith.constant 14 : index
    %c0_43 = arith.constant 0 : index
    %50 = vector.load %arg0[%c14, %c0_43] : memref<16x24xf32, #tpu.memory_space<vmem>>, vector<2x8xf32>
    %c672 = arith.constant 672 : index
    %c0_44 = arith.constant 0 : index
    %51 = vector.load %arg1[%c672, %c0_44] : memref<760x128xf32, #tpu.memory_space<vmem>>, vector<32x32xf32>
    %cst_45 = arith.constant dense<0.000000e+00> : vector<2x32xf32>
    %52 = tpu.matmul %49, %51, %cst_45 {dimension_numbers = #tpu.dot_dimension_numbers<[1], [0], [0], [1], [0, 0, 1, 1], [], []>} : vector<2x32xf32>, vector<32x32xf32>, vector<2x32xf32> -> vector<2x32xf32>
    %c704 = arith.constant 704 : index
    %c0_46 = arith.constant 0 : index
    %53 = vector.load %arg1[%c704, %c0_46] : memref<760x128xf32, #tpu.memory_space<vmem>>, vector<8x32xf32>
    %cst_47 = arith.constant dense<0.000000e+00> : vector<2x32xf32>
    %54 = tpu.matmul %50, %53, %cst_47 {dimension_numbers = #tpu.dot_dimension_numbers<[1], [0], [0], [1], [0, 0, 1, 1], [], []>} : vector<2x8xf32>, vector<8x32xf32>, vector<2x32xf32> -> vector<2x32xf32>
    %55 = arith.addf %52, %54 : vector<2x32xf32>
    %c712 = arith.constant 712 : index
    %c0_48 = arith.constant 0 : index
    %56 = vector.load %arg1[%c712, %c0_48] : memref<760x128xf32, #tpu.memory_space<vmem>>, vector<1x32xf32>
    %57 = vector.broadcast %56 : vector<1x32xf32> to vector<2x32xf32>
    %58 = arith.addf %55, %57 : vector<2x32xf32>
    %cst_49 = arith.constant 0.000000e+00 : f32
    %59 = vector.broadcast %cst_49 : f32 to vector<2x32xf32>
    %60 = arith.maximumf %58, %59 : vector<2x32xf32>
    %c720 = arith.constant 720 : index
    %c0_50 = arith.constant 0 : index
    %61 = vector.load %arg1[%c720, %c0_50] : memref<760x128xf32, #tpu.memory_space<vmem>>, vector<32x5xf32>
    %cst_51 = arith.constant dense<0.000000e+00> : vector<2x5xf32>
    %62 = tpu.matmul %60, %61, %cst_51 {dimension_numbers = #tpu.dot_dimension_numbers<[1], [0], [0], [1], [0, 0, 1, 1], [], []>} : vector<2x32xf32>, vector<32x5xf32>, vector<2x5xf32> -> vector<2x5xf32>
    %c752 = arith.constant 752 : index
    %c0_52 = arith.constant 0 : index
    %63 = vector.load %arg1[%c752, %c0_52] : memref<760x128xf32, #tpu.memory_space<vmem>>, vector<1x5xf32>
    %64 = vector.broadcast %63 : vector<1x5xf32> to vector<2x5xf32>
    %65 = arith.addf %62, %64 : vector<2x5xf32>
    %c0_53 = arith.constant 0 : index
    %c0_54 = arith.constant 0 : index
    %66 = vector.load %arg2[%c0_53, %c0_54] : memref<2x5xf32, #tpu.memory_space<vmem>>, vector<2x5xf32>
    tpu.vector_store %arg2[%c0_53, %c0_54], %65 {strides = array<i32>} : memref<2x5xf32, #tpu.memory_space<vmem>>, vector<2x5xf32>,
    return
  }
}

</mosaic_0001>

<bundles_post_ra>
// kernel: fwd.1
= control target key start
LH: loop header
LB: loop body
LE: loop exit
PB: predicated region body
PF: predicated region fallthrough
CT: control target
= control target key end

     0   :  { %7 = vsyncpa [#allocation5], 0  ;;  %s1630_s0 = inlined_call_operand.vmem [shape: f32[16,24], index: 0, kind: input, shape index: {}]   ;;  %s1631_s1 = inlined_call_operand.hbm [shape: f32[760,128], index: 1, kind: input, shape index: {}]   ;;  %s1632_s2 = inlined_call_operand.hbm [shape: f32[2,5], index: 2, kind: output, shape index: {}]  }
   0x1   :  { %8 = vsyncpa [#allocation6], 0  ;;  %s1472_s9 = smov [#allocation4]  }
   0x2   :  { %s16_s10 = sshll.u32 %s1472_s9, 4  ;;  %s17_s10 = int_to_ptr.vmem [resolvable:$true] %s16_s10 }
   0x3   :  { %s1436_s11 = scalar_lea.vmem %s17_s10, 12160  ;;  %p1441_p1 = scmp.lt.s32.totalorder %s17_s10, %s17_s10 }
   0x4   :  { %p1437_p0 = scmp.ne.s32.totalorder %s17_s10, %s1436_s11  ;;  %p1442_p2 = scmp.lt.s32.totalorder %s1436_s11, %s1436_s11 }
   0x6   :  { %p1443_p3 = por %p1442_p2, %p1441_p1 }
   0x8   :  { %p1444_p4 = pnand %p1443_p3, %p1437_p0 }
   0xa   :  { %1447 = shalt.err (!%p1444_p4)
}
   0xb   :  { %s1473_s12 = smov 128   ;;  %s1474_s13 = smov 8  }
   0xc   :  { %22 = dma.hbm_to_vmem [thread:$0]  %s1631_s1, 12160, %s17_s10, [#allocation5], %s1473_s12, %s1473_s12, %s1474_s13  }
   0xd   :  { %1468 = dma.done.wait [#allocation5], 12160  }
   0xe   :  { %1469 = vsyncadd [#allocation5], 4294955136  ;;  %vm36_vm0 = vcmask 195584   ;;  %v35_v0 = vld [vmem:[#allocation4 + $0x28] sm:$0xff]  ;;  %v34_v1 = vld [vmem:[#allocation4 + $0x20] sm:$0xff]  ;;  %v1475_v17 = vmov 0.0  }
   0xf   :  { %1206 = vmatprep.subr.mxu0 %v35_v0  ;;  %v31_v2 = vld [vmem:[%s1630_s0 + $0x2] sm:$0xff]  ;;  %v122_v3 = vld [vmem:[#allocation4 + $0x40] sm:$0xff]  ;;  %v33_v4 = vld [vmem:[#allocation4 + $0x18] sm:$0xff]  ;;  %vm1476_vm1 = vmmov 0   ;;  %vm567_vm2 = vcmask 521216   ;;  %vm587_vm3 = vcmask 523264  }
  0x10   :  { %1207 = vmatpush3.msra.mxu0 %v35_v0  ;;  %1212 = vmatprep.mubr.msk.f32.mxu0 %vm36_vm0, %v31_v2  ;;  %v121_v5 = vld [vmem:[#allocation4 + $0x38] sm:$0xff]  ;;  %v32_v6 = vld [vmem:[%s1630_s0 + $0xa] sm:$0x3]  ;;  %v29_v9 = vld [vmem:[#allocation4 + $0x8] sm:$0xff]  ;;  %vm830_vm4 = vcmask 64512   ;;  %vm904_vm5 = vcmask 261120  }
  0x11   :  { %1208 = vmatprep.subr.mxu0 %v34_v1  ;;  %1215 = vmatprep.subr.mxu1 %v122_v3  ;;  %v30_v7 = vld [vmem:[#allocation4 + $0x10] sm:$0xff]  ;;  %v28_v11 = vld [vmem:[#allocation4] sm:$0xff]  ;;  %v26_v12 = vld [vmem:[%s1630_s0] sm:$0xff]  ;;  %vm1067_vm6 = vcmask 33792  }
  0x12   :  { %1209 = vmatpush3.msra.mxu0 %v34_v1  ;;  %1216 = vmatpush3.msra.mxu1 %v122_v3  ;;  %v120_v8 = vld [vmem:[#allocation4 + $0x30] sm:$0xff]  ;;  %v331_v15 = vld [vmem:[#allocation4 + $0x148] sm:$0xff]  ;;  %v330_v18 = vld [vmem:[#allocation4 + $0x140] sm:$0xff] }
  0x13   :  { %1210 = vmatprep.subr.mxu0 %v33_v4  ;;  %1217 = vmatprep.subr.mxu1 %v121_v5  ;;  %v118_v10 = vld [vmem:[%s1630_s0 + $0x4] sm:$0xff]  ;;  %v119_v13 = vld [vmem:[%s1630_s0 + $0xc] sm:$0x3]  ;;  %v417_v19 = vld [vmem:[#allocation4 + $0x1c0] sm:$0xff] }
  0x14   :  { %1211 = vmatpush3.msra.mxu0 %v33_v4  ;;  %1218 = vmatpush3.msra.mxu1 %v121_v5  ;;  %v27_v14 = vld [vmem:[%s1630_s0 + $0x8] sm:$0x3]  ;;  %v418_v16 = vld [vmem:[#allocation4 + $0x1c8] sm:$0xff]  ;;  %v329_v20 = vld [vmem:[#allocation4 + $0x138] sm:$0xff] }
  0x15   :  { %1213 = vmatmul.mubr.msk.f32.vlgmr.msra.gmra.mxu0 %vm36_vm0, %v32_v6  ;;  %1224 = vmatprep.subr.mxu0 %v30_v7  ;;  %v416_v21 = vld [vmem:[#allocation4 + $0x1b8] sm:$0xff]  ;;  %v328_v22 = vld [vmem:[#allocation4 + $0x130] sm:$0xff]  ;;  %v327_v24 = vld [vmem:[#allocation4 + $0x128] sm:$0xff] }
  0x16   :  { %1225 = vmatpush3.msra.mxu0 %v30_v7  ;;  %1219 = vmatprep.subr.mxu1 %v120_v8  ;;  %v415_v23 = vld [vmem:[#allocation4 + $0x1b0] sm:$0xff]  ;;  %v414_v25 = vld [vmem:[#allocation4 + $0x1a8] sm:$0xff]  ;;  %v326_v26 = vld [vmem:[#allocation4 + $0x120] sm:$0xff] }
  0x17   :  { %1226 = vmatprep.subr.mxu0 %v29_v9  ;;  %1220 = vmatpush3.msra.mxu1 %v120_v8  ;;  %v413_v27 = vld [vmem:[#allocation4 + $0x1a0] sm:$0xff]  ;;  %v325_v28 = vld [vmem:[#allocation4 + $0x118] sm:$0xff]  ;;  %v324_v30 = vld [vmem:[#allocation4 + $0x110] sm:$0xff] }
  0x18   :  { %1227 = vmatpush3.msra.mxu0 %v29_v9  ;;  %1221 = vmatprep.mubr.msk.f32.mxu1 %vm36_vm0, %v118_v10  ;;  %v412_v29 = vld [vmem:[#allocation4 + $0x198] sm:$0xff]  ;;  %v411_v31 = vld [vmem:[#allocation4 + $0x190] sm:$0xff]  ;;  %v323_v32 = vld [vmem:[#allocation4 + $0x108] sm:$0xff] }
  0x19   :  { %1228 = vmatprep.subr.mxu0 %v28_v11  ;;  %1230 = vmatprep.mubr.msk.f32.mxu0 %vm36_vm0, %v26_v12  ;;  %v410_v33 = vld [vmem:[#allocation4 + $0x188] sm:$0xff]  ;;  %v322_v34 = vld [vmem:[#allocation4 + $0x100] sm:$0xff]  ;;  %v321_v36 = vld [vmem:[#allocation4 + $0xf8] sm:$0xff] }
  0x1a   :  { %1229 = vmatpush3.msra.mxu0 %v28_v11  ;;  %1222 = vmatmul.mubr.msk.f32.vlgmr.msra.gmra.mxu1 %vm36_vm0, %v119_v13  ;;  %v409_v35 = vld [vmem:[#allocation4 + $0x180] sm:$0xff]  ;;  %v408_v37 = vld [vmem:[#allocation4 + $0x178] sm:$0xff]  ;;  %v320_v38 = vld [vmem:[#allocation4 + $0xf0] sm:$0xff] }
  0x1b   :  { %1231 = vmatmul.mubr.msk.f32.vlgmr.msra.gmra.mxu0 %vm36_vm0, %v27_v14  ;;  %1233 = vmatprep.subr.mxu1 %v1475_v17  ;;  %v407_v39 = vld [vmem:[#allocation4 + $0x170] sm:$0xff]  ;;  %v319_v40 = vld [vmem:[#allocation4 + $0xe8] sm:$0xff]  ;;  %v318_v42 = vld [vmem:[#allocation4 + $0xe0] sm:$0xff] }
  0x1c   :  { %1234 = vmatpush3.msra.mxu1 %v331_v15  ;;  %1268 = vmatprep.subr.mxu0 %v1475_v17  ;;  %v406_v41 = vld [vmem:[#allocation4 + $0x168] sm:$0xff]  ;;  %v405_v43 = vld [vmem:[#allocation4 + $0x160] sm:$0xff]  ;;  %v317_v44 = vld [vmem:[#allocation4 + $0xd8] sm:$0xff] }
  0x1d   :  { %1235 = vmatprep.subr.mxu1 %v1475_v17  ;;  %1269 = vmatpush3.msra.mxu0 %v418_v16  ;;  %v404_v45 = vld [vmem:[#allocation4 + $0x158] sm:$0xff]  ;;  %v316_v46 = vld [vmem:[#allocation4 + $0xd0] sm:$0xff]  ;;  %v1090_v53 = vld [vmem:[#allocation4 + $0x48] ss:$0 sm:$0xff] }
  0x1e   :  { %1236 = vmatpush3.msra.mxu1 %v330_v18  ;;  %1270 = vmatprep.subr.mxu0 %v1475_v17  ;;  %v403_v47 = vld [vmem:[#allocation4 + $0x150] sm:$0xff]  ;;  %v314_v63 = vld [vmem:[#allocation4 + $0xc8] sm:$0xff]  ;;  %v313_v2 = vld [vmem:[#allocation4 + $0xc0] sm:$0xff] }
  0x1f   :  { %1237 = vmatprep.subr.mxu1 %v1475_v17  ;;  %1271 = vmatpush3.msra.mxu0 %v417_v19  ;;  %v312_v3 = vld [vmem:[#allocation4 + $0xb8] sm:$0xff]  ;;  %v311_v4 = vld [vmem:[#allocation4 + $0xb0] sm:$0xff]  ;;  %v310_v5 = vld [vmem:[#allocation4 + $0xa8] sm:$0xff] }
  0x20   :  { %1238 = vmatpush3.msra.mxu1 %v329_v20  ;;  %1272 = vmatprep.subr.mxu0 %v1475_v17  ;;  %v309_v6 = vld [vmem:[#allocation4 + $0xa0] sm:$0xff]  ;;  %v308_v7 = vld [vmem:[#allocation4 + $0x98] sm:$0xff]  ;;  %v307_v8 = vld [vmem:[#allocation4 + $0x90] sm:$0xff] }
  0x21   :  { %1239 = vmatprep.subr.mxu1 %v1475_v17  ;;  %1273 = vmatpush3.msra.mxu0 %v416_v21  ;;  %v306_v9 = vld [vmem:[#allocation4 + $0x88] sm:$0xff]  ;;  %v305_v10 = vld [vmem:[#allocation4 + $0x80] sm:$0xff]  ;;  %v304_v11 = vld [vmem:[#allocation4 + $0x78] sm:$0xff] }
  0x22   :  { %1240 = vmatpush3.msra.mxu1 %v328_v22  ;;  %1274 = vmatprep.subr.mxu0 %v1475_v17  ;;  %v303_v12 = vld [vmem:[#allocation4 + $0x70] sm:$0xff]  ;;  %v302_v13 = vld [vmem:[#allocation4 + $0x68] sm:$0xff]  ;;  %v301_v14 = vld [vmem:[#allocation4 + $0x60] sm:$0xff] }
  0x23   :  { %1241 = vmatprep.subr.mxu1 %v1475_v17  ;;  %1275 = vmatpush3.msra.mxu0 %v415_v23  ;;  %v300_v15 = vld [vmem:[#allocation4 + $0x58] sm:$0xff]  ;;  %v299_v16 = vld [vmem:[#allocation4 + $0x50] sm:$0xff]  ;;  %v585_v21 = vld [vmem:[#allocation4 + $0x248] sm:$0xff] }
  0x24   :  { %1242 = vmatpush3.msra.mxu1 %v327_v24  ;;  %1276 = vmatprep.subr.mxu0 %v1475_v17  ;;  %v586_v19 = vld [vmem:[#allocation4 + $0x250] sm:$0xff]  ;;  %v576_v22 = vld [vmem:[#allocation4 + $0x208] sm:$0xff]  ;;  %v584_v23 = vld [vmem:[#allocation4 + $0x240] sm:$0xff] }
  0x25   :  { %1243 = vmatprep.subr.mxu1 %v1475_v17  ;;  %1277 = vmatpush3.msra.mxu0 %v414_v25  ;;  %v577_v20 = vld [vmem:[#allocation4 + $0x210] sm:$0xff]  ;;  %v575_v24 = vld [vmem:[#allocation4 + $0x200] sm:$0xff]  ;;  %v583_v25 = vld [vmem:[#allocation4 + $0x238] sm:$0xff] }
  0x26   :  { %1244 = vmatpush3.msra.mxu1 %v326_v26  ;;  %1278 = vmatprep.subr.mxu0 %v1475_v17  ;;  %v574_v26 = vld [vmem:[#allocation4 + $0x1f8] sm:$0xff] }
  0x27   :  { %1245 = vmatprep.subr.mxu1 %v1475_v17  ;;  %1279 = vmatpush3.msra.mxu0 %v413_v27  ;;  %v582_v27 = vld [vmem:[#allocation4 + $0x230] sm:$0xff] }
  0x28   :  { %1246 = vmatpush3.msra.mxu1 %v325_v28  ;;  %1280 = vmatprep.subr.mxu0 %v1475_v17  ;;  %v573_v28 = vld [vmem:[#allocation4 + $0x1f0] sm:$0xff] }
  0x29   :  { %1247 = vmatprep.subr.mxu1 %v1475_v17  ;;  %1281 = vmatpush3.msra.mxu0 %v412_v29  ;;  %v581_v29 = vld [vmem:[#allocation4 + $0x228] sm:$0xff] }
  0x2a   :  { %1248 = vmatpush3.msra.mxu1 %v324_v30  ;;  %1282 = vmatprep.subr.mxu0 %v1475_v17  ;;  %v572_v30 = vld [vmem:[#allocation4 + $0x1e8] sm:$0xff] }
  0x2b   :  { %1249 = vmatprep.subr.mxu1 %v1475_v17  ;;  %1283 = vmatpush3.msra.mxu0 %v411_v31  ;;  %v580_v31 = vld [vmem:[#allocation4 + $0x220] sm:$0xff] }
  0x2c   :  { %1250 = vmatpush3.msra.mxu1 %v323_v32  ;;  %1284 = vmatprep.subr.mxu0 %v1475_v17  ;;  %v571_v32 = vld [vmem:[#allocation4 + $0x1e0] sm:$0xff] }
  0x2d   :  { %1251 = vmatprep.subr.mxu1 %v1475_v17  ;;  %1285 = vmatpush3.msra.mxu0 %v410_v33  ;;  %v579_v33 = vld [vmem:[#allocation4 + $0x218] sm:$0xff] }
  0x2e   :  { %1252 = vmatpush3.msra.mxu1 %v322_v34  ;;  %1286 = vmatprep.subr.mxu0 %v1475_v17  ;;  %v570_v34 = vld [vmem:[#allocation4 + $0x1d8] sm:$0xff] }
  0x2f   :  { %1253 = vmatprep.subr.mxu1 %v1475_v17  ;;  %1287 = vmatpush3.msra.mxu0 %v409_v35 }
  0x30   :  { %1254 = vmatpush3.msra.mxu1 %v321_v36  ;;  %1288 = vmatprep.subr.mxu0 %v1475_v17 }
  0x31   :  { %1255 = vmatprep.subr.mxu1 %v1475_v17  ;;  %1289 = vmatpush3.msra.mxu0 %v408_v37 }
  0x32   :  { %1256 = vmatpush3.msra.mxu1 %v320_v38  ;;  %1290 = vmatprep.subr.mxu0 %v1475_v17 }
  0x33   :  { %1257 = vmatprep.subr.mxu1 %v1475_v17  ;;  %1291 = vmatpush3.msra.mxu0 %v407_v39 }
  0x34   :  { %1258 = vmatpush3.msra.mxu1 %v319_v40  ;;  %1292 = vmatprep.subr.mxu0 %v1475_v17 }
  0x35   :  { %1259 = vmatprep.subr.mxu1 %v1475_v17  ;;  %1293 = vmatpush3.msra.mxu0 %v406_v41  ;;  %v1091_v41 = vld [vmem:[#allocation4 + $0x1d0] ss:$0 sm:$0xff] }
  0x36   :  { %1260 = vmatpush3.msra.mxu1 %v318_v42  ;;  %1294 = vmatprep.subr.mxu0 %v1475_v17 }
  0x37   :  { %1261 = vmatprep.subr.mxu1 %v1475_v17  ;;  %1295 = vmatpush3.msra.mxu0 %v405_v43 }
  0x38   :  { %1262 = vmatpush3.msra.mxu1 %v317_v44  ;;  %1296 = vmatprep.subr.mxu0 %v1475_v17 }
  0x39   :  { %1263 = vmatprep.subr.mxu1 %v1475_v17  ;;  %1297 = vmatpush3.msra.mxu0 %v404_v45 }
  0x3a   :  { %1264 = vmatpush3.msra.mxu1 %v316_v46  ;;  %1298 = vmatprep.subr.mxu0 %v1475_v17  ;;  %v669_v46 = vld [vmem:[#allocation4 + $0x290] sm:$0xff] }
  0x3b   :  { %1265 = vmatprep.mubr.msk.f32.mxu1 %vm1476_vm1, %v1475_v17  ;;  %1299 = vmatpush3.msra.mxu0 %v403_v47 }
  0x3c   :  { %1300 = vmatprep.mubr.msk.f32.mxu0 %vm1476_vm1, %v1475_v17  ;;  %1303 = vmatprep.subr.mxu1 %v1475_v17 }
  0x3d   :  { %1338 = vmatprep.subr.mxu0 %v1475_v17 }
  0xd5   :  { %v1214_v48 = vpop.f32.mrf.mxu0 }
  0xd7   :  { %v109_v49 = vpop.f32.mrf.mxu0 }
  0xda   :  { %v1223_v50 = vpop.f32.mrf.mxu1 }
  0xdb   :  { %v1232_v51 = vpop.f32.mrf.mxu0 }
  0xdc   :  { %v282_v52 = vadd.f32 %v1232_v51, %v1214_v48  ;;  %v195_v57 = vpop.f32.mrf.mxu1  ;;  %v666_v51 = vld [vmem:[#allocation4 + $0x278] sm:$0xff] }
  0xdd   :  { %v276_v54 = vpop.f32.mrf.mxu0 }
  0xde   :  { %v286_v55 = vadd.f32 %v1223_v50, %v282_v52  ;;  %v277_v56 = vadd.f32 %v276_v54, %v109_v49  ;;  %v668_v49 = vld [vmem:[#allocation4 + $0x288] sm:$0xff]  ;;  %v667_v50 = vld [vmem:[#allocation4 + $0x280] sm:$0xff]  ;;  %v665_v52 = vld [vmem:[#allocation4 + $0x270] sm:$0xff] }
  0xdf   :  { %v663_v54 = vld [vmem:[#allocation4 + $0x260] sm:$0xff] }
  0xe0   :  { %v293_v58 = vadd.f32 %v1090_v53, %v286_v55  ;;  %v285_v59 = vadd.f32 %v277_v56, %v195_v57  ;;  %v662_v55 = vld [vmem:[#allocation4 + $0x258] sm:$0xff]  ;;  %v829_v57 = vld [vmem:[#allocation4 + $0x2c0] sm:$0xff] }
  0xe2   :  { %v295_v60 = vmax.f32 %v293_v58, 0.0  ;;  %v292_v61 = vadd.f32 %v1090_v53, %v285_v59  ;;  %v664_v53 = vld [vmem:[#allocation4 + $0x268] sm:$0xff]  ;;  %v824_v58 = vld [vmem:[%s1630_s0 + $0xe] sm:$0x3]  ;;  %v828_v59 = vld [vmem:[#allocation4 + $0x2b8] sm:$0xff]  ;;  %s1477_s0 = smov [#allocation7]  }
  0xe3   :  { %s1075_s29 = sshll.u32 %s1477_s0, 4  ;;  %s1076_s29 = int_to_ptr.vmem [resolvable:$true] %s1075_s29 }
  0xe4   :  { %297 = vst [vmem:[#allocation2 + $0x8] sm:$0x3] %v295_v60  ;;  %v294_v62 = vmax.f32 %v292_v61, 0.0  ;;  %v827_v60 = vld [vmem:[#allocation4 + $0x2b0] sm:$0xff]  ;;  %v826_v61 = vld [vmem:[#allocation4 + $0x2a8] sm:$0xff]  ;;  %s1448_s30 = scalar_lea.vmem %s1076_s29, 32  ;;  %p1453_p6 = scmp.lt.s32.totalorder %s1076_s29, %s1076_s29 }
  0xe5   :  { %p1449_p5 = scmp.ne.s32.totalorder %s1076_s29, %s1448_s30  ;;  %p1454_p7 = scmp.lt.s32.totalorder %s1448_s30, %s1448_s30 }
  0xe6   :  { %296 = vst [vmem:[#allocation2] sm:$0xff] %v294_v62  ;;  %v825_v62 = vld [vmem:[#allocation4 + $0x2a0] sm:$0xff] }
  0xe7   :  { %p1455_p8 = por %p1454_p7, %p1453_p6 }
  0xe9   :  { %p1456_p9 = pnand %p1455_p8, %p1449_p5 }
  0xed   :  { %v315_v0 = vld [vmem:[#allocation2 + $0x2] sm:$0x3f] }
  0xee   :  { %v402_v1 = vld [vmem:[#allocation2 + $0x4] sm:$0x3f]  ;;  %1266 = vmatmul.mubr.f32.vlgmr.msra.gmra.mxu1 %v315_v0 }
  0xef   :  { %1301 = vmatmul.mubr.f32.vlgmr.msra.gmra.mxu0 %v402_v1  ;;  %1304 = vmatpush3.msra.mxu1 %v314_v63  ;;  %v298_v18 = vld [vmem:[#allocation2] sm:$0x3f] }
  0xf0   :  { %1335 = vmatprep.mubr.msk.f32.mxu1 %vm1476_vm1, %v1475_v17  ;;  %1305 = vmatprep.subr.mxu1 %v1475_v17 }
  0xf1   :  { %1354 = vmatprep.mubr.msk.f32.mxu0 %vm1476_vm1, %v1475_v17  ;;  %1306 = vmatpush3.msra.mxu1 %v313_v2 }
  0xf2   :  { %1307 = vmatprep.subr.mxu1 %v1475_v17  ;;  %1339 = vmatpush3.msra.mxu0 %v586_v19 }
  0xf3   :  { %1308 = vmatpush3.msra.mxu1 %v312_v3  ;;  %1340 = vmatprep.subr.mxu0 %v1475_v17 }
  0xf4   :  { %1309 = vmatprep.subr.mxu1 %v1475_v17  ;;  %1341 = vmatpush3.msra.mxu0 %v585_v21 }
  0xf5   :  { %1310 = vmatpush3.msra.mxu1 %v311_v4  ;;  %1342 = vmatprep.subr.mxu0 %v1475_v17 }
  0xf6   :  { %1311 = vmatprep.subr.mxu1 %v1475_v17  ;;  %1343 = vmatpush3.msra.mxu0 %v584_v23  ;;  %v1099_v23 = vld [vmem:[#allocation4 + $0x2f0] ss:$0 sm:$0xff] }
  0xf7   :  { %1312 = vmatpush3.msra.mxu1 %v310_v5  ;;  %1344 = vmatprep.subr.mxu0 %v1475_v17  ;;  %v1095_v5 = vld [vmem:[#allocation4 + $0x298] ss:$0 sm:$0xff] }
  0xf8   :  { %1313 = vmatprep.subr.mxu1 %v1475_v17  ;;  %1345 = vmatpush3.msra.mxu0 %v583_v25 }
  0xf9   :  { %1314 = vmatpush3.msra.mxu1 %v309_v6  ;;  %1346 = vmatprep.subr.mxu0 %v1475_v17 }
  0xfa   :  { %1315 = vmatprep.subr.mxu1 %v1475_v17  ;;  %1347 = vmatpush3.msra.mxu0 %v582_v27 }
  0xfb   :  { %1316 = vmatpush3.msra.mxu1 %v308_v7  ;;  %1348 = vmatprep.subr.mxu0 %v1475_v17 }
  0xfc   :  { %1317 = vmatprep.subr.mxu1 %v1475_v17  ;;  %1349 = vmatpush3.msra.mxu0 %v581_v29 }
  0xfd   :  { %1318 = vmatpush3.msra.mxu1 %v307_v8  ;;  %1350 = vmatprep.subr.mxu0 %v1475_v17 }
  0xfe   :  { %1319 = vmatprep.subr.mxu1 %v1475_v17  ;;  %1351 = vmatpush3.msra.mxu0 %v580_v31 }
  0xff   :  { %1320 = vmatpush3.msra.mxu1 %v306_v9  ;;  %1352 = vmatprep.subr.mxu0 %v1475_v17 }
 0x100   :  { %1321 = vmatprep.subr.mxu1 %v1475_v17  ;;  %1353 = vmatpush3.msra.mxu0 %v579_v33 }
 0x101   :  { %1322 = vmatpush3.msra.mxu1 %v305_v10  ;;  %1357 = vmatprep.subr.mxu0 %v1475_v17 }
 0x102   :  { %1323 = vmatprep.subr.mxu1 %v1475_v17 }
 0x103   :  { %1324 = vmatpush3.msra.mxu1 %v304_v11 }
 0x104   :  { %1325 = vmatprep.subr.mxu1 %v1475_v17 }
 0x105   :  { %1326 = vmatpush3.msra.mxu1 %v303_v12  ;;  %v988_v12 = vld [vmem:[#allocation4 + $0x2e8] sm:$0xff] }
 0x106   :  { %1327 = vmatprep.subr.mxu1 %v1475_v17 }
 0x107   :  { %1328 = vmatpush3.msra.mxu1 %v302_v13  ;;  %v987_v13 = vld [vmem:[#allocation4 + $0x2e0] sm:$0xff] }
 0x108   :  { %1329 = vmatprep.subr.mxu1 %v1475_v17 }
 0x109   :  { %1330 = vmatpush3.msra.mxu1 %v301_v14  ;;  %v986_v14 = vld [vmem:[#allocation4 + $0x2d8] sm:$0xff] }
 0x10a   :  { %1331 = vmatprep.subr.mxu1 %v1475_v17 }
 0x10b   :  { %1332 = vmatpush3.msra.mxu1 %v300_v15  ;;  %v985_v15 = vld [vmem:[#allocation4 + $0x2d0] sm:$0xff] }
 0x10c   :  { %1333 = vmatprep.subr.mxu1 %v1475_v17 }
 0x10d   :  { %1334 = vmatpush3.msra.mxu1 %v299_v16 }
 0x10e   :  { %1336 = vmatmul.mubr.f32.vlgmr.msra.gmra.mxu1 %v298_v18  ;;  %1376 = vmatprep.subr.mxu1 %v1475_v17  ;;  %v1098_v18 = vld [vmem:[#allocation4 + $0x2c8] ss:$0 sm:$0xff] }
 0x10f   :  { %1392 = vmatprep.mubr.msk.f32.mxu1 %vm1476_vm1, %v1475_v17  ;;  %1377 = vmatpush3.msra.mxu1 %v577_v20 }
 0x110   :  { %1378 = vmatprep.subr.mxu1 %v1475_v17 }
 0x111   :  { %1379 = vmatpush3.msra.mxu1 %v576_v22 }
 0x112   :  { %1380 = vmatprep.subr.mxu1 %v1475_v17 }
 0x113   :  { %1381 = vmatpush3.msra.mxu1 %v575_v24 }
 0x114   :  { %1382 = vmatprep.subr.mxu1 %v1475_v17 }
 0x115   :  { %1383 = vmatpush3.msra.mxu1 %v574_v26 }
 0x116   :  { %1384 = vmatprep.subr.mxu1 %v1475_v17 }
 0x117   :  { %1385 = vmatpush3.msra.mxu1 %v573_v28 }
 0x118   :  { %1386 = vmatprep.subr.mxu1 %v1475_v17 }
 0x119   :  { %1387 = vmatpush3.msra.mxu1 %v572_v30 }
 0x11a   :  { %1388 = vmatprep.subr.mxu1 %v1475_v17 }
 0x11b   :  { %1389 = vmatpush3.msra.mxu1 %v571_v32 }
 0x11c   :  { %1390 = vmatprep.subr.mxu1 %v1475_v17 }
 0x11d   :  { %1391 = vmatpush3.msra.mxu1 %v570_v34 }
 0x11e   :  { %1411 = vmatprep.subr.mxu1 %v1475_v17 }
 0x1ae   :  { %v398_v35 = vpop.f32.mrf.mxu1 }
 0x1af   :  { %v485_v36 = vpop.f32.mrf.mxu0 }
 0x1b0   :  { %v1267_v37 = vpop.f32.mrf.mxu1 }
 0x1b1   :  { %v1302_v38 = vpop.f32.mrf.mxu0 }
 0x1ce   :  { %v555_v39 = vpop.f32.mrf.mxu1 }
 0x1cf   :  { %v556_v40 = vadd.f32 %v555_v39, %v398_v35 }
 0x1d0   :  { %v1337_v42 = vpop.f32.mrf.mxu1 }
 0x1d1   :  { %v559_v43 = vadd.f32 %v556_v40, %v485_v36 }
 0x1d3   :  { %v565_v44 = vadd.f32 %v1091_v41, %v559_v43 }
 0x1d5   :  { %v566_v45 = vmax.f32 %v565_v44, 0.0 }
 0x1d7   :  { %568 = vst.msk [vmem:[#allocation3] sm:$0x3f] %vm567_vm2, %v566_v45 }
 0x1de   :  { %v578_v47 = vld [vmem:[#allocation3 + $0x2] sm:$0x3]  ;;  %v569_v48 = vld [vmem:[#allocation3] sm:$0x3]  ;;  %v661_v56 = vld [vmem:[#allocation3 + $0x4] sm:$0x3] }
 0x1df   :  { %1355 = vmatmul.mubr.msk.f32.vlgmr.msra.gmra.mxu0 %vm587_vm3, %v578_v47  ;;  %1393 = vmatmul.mubr.msk.f32.vlgmr.msra.gmra.mxu1 %vm587_vm3, %v569_v48 }
 0x1e0   :  { %1358 = vmatpush3.msra.mxu0 %v669_v46  ;;  %1373 = vmatprep.mubr.msk.f32.mxu0 %vm1476_vm1, %v1475_v17 }
 0x1e1   :  { %1359 = vmatprep.subr.mxu0 %v1475_v17  ;;  %1419 = vmatprep.mubr.msk.f32.mxu1 %vm1476_vm1, %v1475_v17 }
 0x1e2   :  { %1360 = vmatpush3.msra.mxu0 %v668_v49  ;;  %1412 = vmatpush3.msra.mxu1 %v988_v12 }
 0x1e3   :  { %1361 = vmatprep.subr.mxu0 %v1475_v17  ;;  %1413 = vmatprep.subr.mxu1 %v1475_v17 }
 0x1e4   :  { %1362 = vmatpush3.msra.mxu0 %v667_v50  ;;  %1414 = vmatpush3.msra.mxu1 %v987_v13 }
 0x1e5   :  { %1363 = vmatprep.subr.mxu0 %v1475_v17  ;;  %1415 = vmatprep.subr.mxu1 %v1475_v17 }
 0x1e6   :  { %1364 = vmatpush3.msra.mxu0 %v666_v51  ;;  %1416 = vmatpush3.msra.mxu1 %v986_v14 }
 0x1e7   :  { %1365 = vmatprep.subr.mxu0 %v1475_v17  ;;  %1417 = vmatprep.subr.mxu1 %v1475_v17 }
 0x1e8   :  { %1366 = vmatpush3.msra.mxu0 %v665_v52  ;;  %1418 = vmatpush3.msra.mxu1 %v985_v15 }
 0x1e9   :  { %1367 = vmatprep.subr.mxu0 %v1475_v17 }
 0x1ea   :  { %1368 = vmatpush3.msra.mxu0 %v664_v53 }
 0x1eb   :  { %1369 = vmatprep.subr.mxu0 %v1475_v17 }
 0x1ec   :  { %1370 = vmatpush3.msra.mxu0 %v663_v54 }
 0x1ed   :  { %1371 = vmatprep.subr.mxu0 %v1475_v17 }
 0x1ee   :  { %1372 = vmatpush3.msra.mxu0 %v662_v55 }
 0x1ef   :  { %1374 = vmatmul.mubr.msk.f32.vlgmr.msra.gmra.mxu0 %vm587_vm3, %v661_v56  ;;  %1395 = vmatprep.subr.mxu0 %v1475_v17 }
 0x1f0   :  { %1397 = vmatprep.mubr.msk.f32.mxu0 %vm1476_vm1, %v1475_v17  ;;  %1396 = vmatpush3.msra.mxu0 %v829_v57 }
 0x1f1   :  { %1400 = vmatprep.subr.mxu0 %v1475_v17 }
 0x1f3   :  { %1398 = vmatmul.mubr.msk.f32.vlgmr.msra.gmra.mxu0 %vm830_vm4, %v824_v58 }
 0x1f4   :  { %1408 = vmatprep.mubr.msk.f32.mxu0 %vm1476_vm1, %v1475_v17  ;;  %1401 = vmatpush3.msra.mxu0 %v828_v59 }
 0x1f5   :  { %1402 = vmatprep.subr.mxu0 %v1475_v17 }
 0x1f6   :  { %1403 = vmatpush3.msra.mxu0 %v827_v60 }
 0x1f7   :  { %1404 = vmatprep.subr.mxu0 %v1475_v17 }
 0x1f8   :  { %1405 = vmatpush3.msra.mxu0 %v826_v61 }
 0x1f9   :  { %1406 = vmatprep.subr.mxu0 %v1475_v17 }
 0x1fa   :  { %1407 = vmatpush3.msra.mxu0 %v825_v62 }
 0x29f   :  { %v657_v63 = vpop.f32.mrf.mxu0  ;;  %v812_v0 = vpop.f32.mrf.mxu1 }
 0x2a0   :  { %v813_v3 = vadd.f32 %v812_v0, %v657_v63 }
 0x2a1   :  { %v1356_v1 = vpop.f32.mrf.mxu0  ;;  %v1394_v2 = vpop.f32.mrf.mxu1 }
 0x2af   :  { %v739_v4 = vpop.f32.mrf.mxu0 }
 0x2b0   :  { %v816_v6 = vadd.f32 %v813_v3, %v739_v4 }
 0x2b1   :  { %v1375_v7 = vpop.f32.mrf.mxu0 }
 0x2b2   :  { %v822_v8 = vadd.f32 %v1095_v5, %v816_v6 }
 0x2b3   :  { %v900_v10 = vpop.f32.mrf.mxu0 }
 0x2b4   :  { %v823_v9 = vmax.f32 %v822_v8, 0.0 }
 0x2b5   :  { %v1399_v11 = vpop.f32.mrf.mxu0 }
 0x2b6   :  { %1409 = vmatmul.mubr.msk.f32.vlgmr.msra.gmra.mxu0 %vm904_vm5, %v823_v9 }
 0x376   :  { %v974_v16 = vpop.f32.mrf.mxu0 }
 0x377   :  { %v975_v19 = vadd.f32 %v974_v16, %v900_v10 }
 0x378   :  { %v1410_v20 = vpop.f32.mrf.mxu0 }
 0x379   :  { %v983_v21 = vadd.f32 %v1098_v18, %v975_v19 }
 0x37b   :  { %v984_v22 = vmax.f32 %v983_v21, 0.0 }
 0x37d   :  { %1420 = vmatmul.mubr.msk.f32.vlgmr.msra.gmra.mxu1 %vm904_vm5, %v984_v22 }
 0x43d   :  { %v1063_v24 = vpop.f32.mrf.mxu1 }
 0x43e   :  { %v1064_v25 = vadd.f32 %v1099_v23, %v1063_v24 }
 0x43f   :  { %v1421_v26 = vpop.f32.mrf.mxu1 }
 0x440   :  { %1068 = vst.msk [vmem:[#allocation7] sm:$0x3] %vm1067_vm6, %v1064_v25 }
 0x441   :  { %1459 = shalt.err (!%p1456_p9)
}
 0x442   :  { %1078 = dma.vmem_to_hbm [thread:$0]  %s1076_s29, 32, %s1632_s2, [#allocation6]  }
 0x443   :  { %1470 = dma.done.wait [#allocation6], 32  }
 0x444   :  { %1471 = vsyncadd [#allocation6], 4294967264 }
 0x445   :  { %1082 = vsyncpa [#allocation5], 1 }
 0x446   :  { %1083 = vsyncpa [#allocation6], 1 }

</bundles_post_ra>
